<compile_context>
chip_gen: v5e
topology: v5e:2x2
jax: 0.10.0
libtpu: 0.0.40
codegen_flags: <defaults>
</compile_context>

<pallas_src>
import functools

import jax
import jax.numpy as jnp
from jax.experimental import pallas as pl
from jax.experimental.pallas import tpu as pltpu


def _kl_div_kernel(t_ref, s_ref, out_ref, *, inv_T, n_total, hw_total,
                   block_n, block_hw):
    """One grid step: sum of KL(p_t || p_s) over a (block_n, C, block_hw) tile."""
    i = pl.program_id(0)  # batch-block index
    j = pl.program_id(1)  # spatial-block index

    t = t_ref[...].astype(jnp.float32) * inv_T    # (BN, C, BHW) teacher logits / T
    s = s_ref[...].astype(jnp.float32) * inv_T    # (BN, C, BHW) student logits / T

    # Mask ragged batch rows / spatial columns (static check -> no mask code when
    # the grid divides evenly). With t == s == 0 across the whole channel axis the
    # per-element KL is exactly 0, so no output correction is needed.
    need_n = (n_total % block_n) != 0
    need_hw = (hw_total % block_hw) != 0
    if need_n or need_hw:
        valid = None
        if need_n:
            row = jax.lax.broadcasted_iota(jnp.int32, t.shape, 0)
            valid = (row + i * block_n) < n_total
        if need_hw:
            col = jax.lax.broadcasted_iota(jnp.int32, t.shape, 2)
            vhw = (col + j * block_hw) < hw_total
            valid = vhw if valid is None else (valid & vhw)
        t = jnp.where(valid, t, 0.0)
        s = jnp.where(valid, s, 0.0)

    # Numerically stable softmax statistics over the channel axis (axis=1).
    t_shift = t - jnp.max(t, axis=1, keepdims=True)
    s_shift = s - jnp.max(s, axis=1, keepdims=True)
    exp_t = jnp.exp(t_shift)
    exp_s = jnp.exp(s_shift)
    sum_t = jnp.sum(exp_t, axis=1, keepdims=True)
    sum_s = jnp.sum(exp_s, axis=1, keepdims=True)

    # p_t = softmax(t): reuse exp_t instead of exp(log_softmax(t)).
    p_t = exp_t * (1.0 / sum_t)
    # log_softmax(t) - log_softmax(s) = (t_shift - s_shift) + (log sum_s - log sum_t)
    log_ratio = (t_shift - s_shift) + (jnp.log(sum_s) - jnp.log(sum_t))

    out_ref[...] = jnp.reshape(jnp.sum(p_t * log_ratio), (1, 1))  # partial sum


def _choose_blocks(n, c, hw, itemsize, target_bytes=1 << 20):
    """Pick (block_n, block_hw) so one input block is ~target_bytes (~1 MiB).

    block_hw is a multiple of 128 (lane-aligned) or the full spatial extent;
    the remaining budget is filled with whole batch samples."""
    target_elems = max(1, target_bytes // max(1, itemsize))
    if hw <= 128:
        bhw = hw
    else:
        want = max(128, target_elems // max(1, c))
        bhw = min((want // 128) * 128, hw)
        if bhw >= hw:
            bhw = hw
    bn = int(min(n, max(1, target_elems // max(1, c * bhw))))
    return bn, bhw


def _kl_div_mean(teacher_x, student_x, *, T=1.0, block_n=None, block_hw=None):
    """T^2 * KLDivLoss(reduction='mean')(log_softmax(s/T,1), softmax(t/T,1)) for one head."""
    assert teacher_x.shape == student_x.shape, "teacher/student head shapes must match"
    assert teacher_x.ndim >= 2, "expected (N, C, ...) with softmax over dim 1"
    N, C = int(teacher_x.shape[0]), int(teacher_x.shape[1])
    HW = 1
    for d in teacher_x.shape[2:]:
        HW *= int(d)
    HW = max(HW, 1)

    # Free, contiguous reshape: big spatial extent -> lane axis, channels -> sublanes.
    t3 = teacher_x.reshape(N, C, HW)
    s3 = student_x.reshape(N, C, HW)

    auto_bn, auto_bhw = _choose_blocks(N, C, HW, jnp.dtype(teacher_x.dtype).itemsize)
    if block_n is None:
        block_n = auto_bn
    if block_hw is None:
        block_hw = auto_bhw

    n_blocks = pl.cdiv(N, block_n)
    hw_blocks = pl.cdiv(HW, block_hw)
    total_blocks = n_blocks * hw_blocks

    kernel = functools.partial(
        _kl_div_kernel, inv_T=float(1.0 / T), n_total=N, hw_total=HW,
        block_n=block_n, block_hw=block_hw)

    partials = pl.pallas_call(
        kernel,
        out_shape=jax.ShapeDtypeStruct((total_blocks, 1), jnp.float32),
        grid=(n_blocks, hw_blocks),
        in_specs=[
            pl.BlockSpec((block_n, C, block_hw), lambda i, j: (i, 0, j)),
            pl.BlockSpec((block_n, C, block_hw), lambda i, j: (i, 0, j)),
        ],
        out_specs=pl.BlockSpec((1, 1), lambda i, j, hwb=hw_blocks: (i * hwb + j, 0)),
        compiler_params=pltpu.CompilerParams(
            dimension_semantics=("parallel", "parallel"),  # independent blocks -> megacore
            vmem_limit_bytes=32 * 1024 * 1024,             # explicit (v5e default is 16 MiB)
        ),
    )(t3, s3)

    total_elems = N * C * HW  # reduction='mean' divides by ALL elements
    return (T * T) * jnp.sum(partials) / jnp.float32(total_elems)


def kl_div_loss(teacher, student, *, T=1.0, lambda_=0.5, box_kd=True, code_weights=None):
    """Pallas equivalent of KLDivLoss.forward(teacher, student).

    teacher / student: dicts (or lists) of logit tensors with matching shapes;
    softmax over dim=1 of each tensor. lambda_/box_kd/code_weights are stored by
    the PyTorch module but unused in its forward; kept for signature parity."""
    t_items = teacher.values() if hasattr(teacher, "values") else teacher
    s_items = student.values() if hasattr(student, "values") else student
    kd_loss = jnp.float32(0.0)
    for t_x, s_x in zip(t_items, s_items):
        kd_loss = kd_loss + _kl_div_mean(t_x, s_x, T=T)
    return kd_loss


# ----------------------------- reference (pure JAX) -----------------------------

def _reference_kl_single(t_x, s_x, T):
    log_p_s = jax.nn.log_softmax(s_x.astype(jnp.float32) / T, axis=1)
    log_p_t = jax.nn.log_softmax(t_x.astype(jnp.float32) / T, axis=1)
    p_t = jnp.exp(log_p_t)
    return (T * T) * jnp.mean(p_t * (log_p_t - log_p_s))


def _reference_loss(teacher, student, T=1.0):
    total = jnp.float32(0.0)
    for t_x, s_x in zip(teacher.values(), student.values()):
        total = total + _reference_kl_single(t_x, s_x, T)
    return total


if __name__ == "__main__":
    key = jax.random.PRNGKey(0)
    k1, k2, k3, k4, k5, k6 = jax.random.split(key, 6)

    # Small dict of "heads" like a CenterNet teacher/student output: softmax over dim=1.
    teacher = {
        "hm":  jax.random.normal(k1, (2, 4, 16, 16), dtype=jnp.float32),
        "reg": jax.random.normal(k3, (2, 8, 16, 16), dtype=jnp.bfloat16),  # bf16 streaming path
    }
    student = {
        "hm":  jax.random.normal(k2, (2, 4, 16, 16), dtype=jnp.float32),
        "reg": jax.random.normal(k4, (2, 8, 16, 16), dtype=jnp.bfloat16),
    }

    # Full forward (T=1.0, matching the module defaults).
    loss = jax.block_until_ready(kl_div_loss(teacher, student, T=1.0))
    ref = _reference_loss(teacher, student, T=1.0)
    assert jnp.allclose(loss, ref, rtol=1e-5, atol=1e-6), (loss, ref)

    # Non-unit temperature.
    loss_T = jax.block_until_ready(kl_div_loss(teacher, student, T=2.0))
    ref_T = _reference_loss(teacher, student, T=2.0)
    assert jnp.allclose(loss_T, ref_T, rtol=1e-5, atol=1e-6), (loss_T, ref_T)

    # Ragged grid in BOTH axes: N=3 with block_n=2 and HW=192 with block_hw=128
    # (exercises the in-kernel batch + spatial masking and the multi-block output).
    t_r = jax.random.normal(k5, (3, 4, 16, 12), dtype=jnp.float32)
    s_r = jax.random.normal(k6, (3, 4, 16, 12), dtype=jnp.float32)
    loss_r = jax.block_until_ready(
        _kl_div_mean(t_r, s_r, T=1.0, block_n=2, block_hw=128))
    ref_r = _reference_kl_single(t_r, s_r, 1.0)
    assert jnp.allclose(loss_r, ref_r, rtol=1e-5, atol=1e-6), (loss_r, ref_r)

    print("KERNEL_OK")
</pallas_src>

<mosaic_0001>
module attributes {stable_mosaic.version = 11 : i64} {
  func.func @_kl_div_kernel(%arg0: i32, %arg1: i32, %arg2: memref<2x4x256xf32, #tpu.memory_space<vmem>>, %arg3: memref<2x4x256xf32, #tpu.memory_space<vmem>>, %arg4: memref<1x1xf32, #tpu.memory_space<vmem>>) attributes {dimension_semantics = [#tpu.dimension_semantics<parallel>, #tpu.dimension_semantics<parallel>], iteration_bounds = array<i64: 1, 1>, scalar_prefetch = 0 : i64, scratch_operands = 0 : i64, tpu.core_type = #tpu.core_type<tc>, window_params = [{transform_indices = @transform_0, window_bounds = array<i64: 2, 4, 256>}, {transform_indices = @transform_1, window_bounds = array<i64: 2, 4, 256>}, {transform_indices = @transform_2, window_bounds = array<i64: 1, 1>}]} {
    %c0 = arith.constant 0 : index
    %c0_0 = arith.constant 0 : index
    %c0_1 = arith.constant 0 : index
    %0 = vector.load %arg2[%c0, %c0_0, %c0_1] : memref<2x4x256xf32, #tpu.memory_space<vmem>>, vector<2x4x256xf32>
    %cst = arith.constant 1.000000e+00 : f32
    %1 = vector.broadcast %cst : f32 to vector<2x4x256xf32>
    %2 = arith.mulf %0, %1 : vector<2x4x256xf32>
    %c0_2 = arith.constant 0 : index
    %c0_3 = arith.constant 0 : index
    %c0_4 = arith.constant 0 : index
    %3 = vector.load %arg3[%c0_2, %c0_3, %c0_4] : memref<2x4x256xf32, #tpu.memory_space<vmem>>, vector<2x4x256xf32>
    %cst_5 = arith.constant 1.000000e+00 : f32
    %4 = vector.broadcast %cst_5 : f32 to vector<2x4x256xf32>
    %5 = arith.mulf %3, %4 : vector<2x4x256xf32>
    %cst_6 = arith.constant dense<0xFF800000> : vector<2x256xf32>
    %6 = vector.multi_reduction <maximumf>, %2, %cst_6 [1] : vector<2x4x256xf32> to vector<2x256xf32>
    %7 = vector.shape_cast %6 : vector<2x256xf32> to vector<2x1x256xf32>
    %8 = vector.broadcast %7 : vector<2x1x256xf32> to vector<2x4x256xf32>
    %9 = arith.subf %2, %8 : vector<2x4x256xf32>
    %cst_7 = arith.constant dense<0xFF800000> : vector<2x256xf32>
    %10 = vector.multi_reduction <maximumf>, %5, %cst_7 [1] : vector<2x4x256xf32> to vector<2x256xf32>
    %11 = vector.shape_cast %10 : vector<2x256xf32> to vector<2x1x256xf32>
    %12 = vector.broadcast %11 : vector<2x1x256xf32> to vector<2x4x256xf32>
    %13 = arith.subf %5, %12 : vector<2x4x256xf32>
    %14 = math.exp %9 : vector<2x4x256xf32>
    %15 = math.exp %13 : vector<2x4x256xf32>
    %cst_8 = arith.constant dense<0.000000e+00> : vector<2x256xf32>
    %16 = vector.multi_reduction <add>, %14, %cst_8 [1] : vector<2x4x256xf32> to vector<2x256xf32>
    %17 = vector.shape_cast %16 : vector<2x256xf32> to vector<2x1x256xf32>
    %cst_9 = arith.constant dense<0.000000e+00> : vector<2x256xf32>
    %18 = vector.multi_reduction <add>, %15, %cst_9 [1] : vector<2x4x256xf32> to vector<2x256xf32>
    %19 = vector.shape_cast %18 : vector<2x256xf32> to vector<2x1x256xf32>
    %cst_10 = arith.constant 1.000000e+00 : f32
    %20 = vector.broadcast %cst_10 : f32 to vector<2x1x256xf32>
    %21 = arith.divf %20, %17 : vector<2x1x256xf32>
    %22 = vector.broadcast %21 : vector<2x1x256xf32> to vector<2x4x256xf32>
    %23 = arith.mulf %14, %22 : vector<2x4x256xf32>
    %24 = arith.subf %9, %13 : vector<2x4x256xf32>
    %25 = math.log %19 : vector<2x1x256xf32>
    %26 = math.log %17 : vector<2x1x256xf32>
    %27 = arith.subf %25, %26 : vector<2x1x256xf32>
    %28 = vector.broadcast %27 : vector<2x1x256xf32> to vector<2x4x256xf32>
    %29 = arith.addf %24, %28 : vector<2x4x256xf32>
    %30 = arith.mulf %23, %29 : vector<2x4x256xf32>
    %31 = vector.shape_cast %30 : vector<2x4x256xf32> to vector<1x2x4x256xf32>
    %cst_11 = arith.constant dense<0.000000e+00> : vector<1xf32>
    %32 = vector.multi_reduction <add>, %31, %cst_11 [1, 2, 3] : vector<1x2x4x256xf32> to vector<1xf32>
    %33 = vector.shape_cast %32 : vector<1xf32> to vector<1x1x1x1xf32>
    %34 = vector.extract %33[0, 0, 0, 0] : f32 from vector<1x1x1x1xf32>
    %35 = vector.broadcast %34 : f32 to vector<1x1xf32>
    %c0_12 = arith.constant 0 : index
    %c0_13 = arith.constant 0 : index
    %36 = vector.load %arg4[%c0_12, %c0_13] : memref<1x1xf32, #tpu.memory_space<vmem>>, vector<1x1xf32>
    tpu.vector_store %arg4[%c0_12, %c0_13], %35 {strides = array<i32>} : memref<1x1xf32, #tpu.memory_space<vmem>>, vector<1x1xf32>,
    return
  }
  func.func @transform_0(%arg0: i32, %arg1: i32) -> (i32, i32, i32) {
    %c0_i32 = arith.constant 0 : i32
    %c0_i32_0 = arith.constant 0 : i32
    return %arg0, %c0_i32, %arg1 : i32, i32, i32
  }
  func.func @transform_1(%arg0: i32, %arg1: i32) -> (i32, i32, i32) {
    %c0_i32 = arith.constant 0 : i32
    %c0_i32_0 = arith.constant 0 : i32
    return %arg0, %c0_i32, %arg1 : i32, i32, i32
  }
  func.func @transform_2(%arg0: i32, %arg1: i32) -> (i32, i32) {
    %c1_i32 = arith.constant 1 : i32
    %0 = arith.muli %arg0, %c1_i32 : i32
    %1 = arith.addi %0, %arg1 : i32
    %c0_i32 = arith.constant 0 : i32
    %c0_i32_0 = arith.constant 0 : i32
    return %1, %c0_i32 : i32, i32
  }
}

</mosaic_0001>

<bundles_post_ra>
// kernel: tpu_custom_call.1
= control target key start
LH: loop header
LB: loop body
LE: loop exit
PB: predicated region body
PF: predicated region fallthrough
CT: control target
= control target key end

     0   :  { %7 = vsyncpa [#allocation3], 0  ;;  %s708_s0 = inlined_call_operand.hbm [shape: f32[2,4,256], index: 0, kind: input, shape index: {}]   ;;  %s709_s1 = inlined_call_operand.hbm [shape: f32[2,4,256], index: 1, kind: input, shape index: {}]   ;;  %s710_s2 = inlined_call_operand.hbm [shape: f32[1,1], index: 2, kind: output, shape index: {}]  }
   0x1   :  { %8 = vsyncpa [#allocation6], 0 }
   0x2   :  { %9 = vsyncpa [#allocation4], 0  ;;  %s14_s11 = sshll.u32 %s708_s0, 4  ;;  %s523_s12 = smov [#allocation2]   ;;  %s15_s11 = int_to_ptr.hbm [resolvable:$true] %s14_s11 }
   0x3   :  { %s16_s13 = sshll.u32 %s523_s12, 4  ;;  %s27_s16 = sshll.u32 %s709_s1, 4  ;;  %s17_s13 = int_to_ptr.vmem [resolvable:$true] %s16_s13  ;;  %s28_s16 = int_to_ptr.hbm [resolvable:$true] %s27_s16 }
   0x4   :  { %s524_s17 = smov 128   ;;  %s525_s18 = smov 8  }
   0x5   :  { %22 = dma.hbm_to_vmem [thread:$0]  %s15_s11, 256, %s17_s13, [#allocation3], %s524_s17, %s524_s17, %s525_s18  }
   0x6   :  { %s526_s19 = smov [#allocation5]  }
   0x7   :  { %s29_s20 = sshll.u32 %s526_s19, 4  ;;  %s30_s20 = int_to_ptr.vmem [resolvable:$true] %s29_s20 }
   0x8   :  { %35 = dma.hbm_to_vmem [thread:$0]  %s28_s16, 256, %s30_s20, [#allocation6], %s524_s17, %s524_s17, %s525_s18  }
   0x9   :  { %517 = dma.done.wait [#allocation3], 256  }
   0xa   :  { %518 = vsyncadd [#allocation3], 4294967040 }
   0xb   :  { %519 = dma.done.wait [#allocation6], 256  }
   0xc   :  { %520 = vsyncadd [#allocation6], 4294967040  ;;  %v45_v0 = vld [vmem:[#allocation2] sm:$0xff]  ;;  %v46_v1 = vld [vmem:[#allocation2 + $0x8] sm:$0xff]  ;;  %vm62_vm0 = vcmask 1043456   ;;  %s527_s0 = smov [#allocation7]  }
   0xd   :  { %51 = vst [vmem:[#allocation1] ss:$2 sm:$0xff] %v45_v0  ;;  %v549_v2 = vld [vmem:[#allocation5] sm:$0xff]  ;;  %v551_v3 = vld [vmem:[#allocation5 + $0x8] sm:$0xff]  ;;  %s393_s1 = sshll.u32 %s527_s0, 4  ;;  %s395_s23 = sshll.u32 %s710_s2, 4  ;;  %s394_s1 = int_to_ptr.vmem [resolvable:$true] %s393_s1  ;;  %s396_s23 = int_to_ptr.hbm [resolvable:$true] %s395_s23 }
   0xe   :  { %55 = vst [vmem:[#allocation1 + $0x10] ss:$2 sm:$0xff] %v46_v1 }
  0x14   :  { %v52_v4 = vld.sshfl [vmem:[#allocation1] sm:$0xff pattern:$0x75316420]  ;;  %v53_v5 = vld.sshfl [vmem:[#allocation1 + $0x8] sm:$0xff pattern:$0x75316420] }
  0x15   :  { %v56_v6 = vld.sshfl [vmem:[#allocation1 + $0x10] sm:$0xff pattern:$0x75316420]  ;;  %v57_v7 = vld.sshfl [vmem:[#allocation1 + $0x18] sm:$0xff pattern:$0x75316420] }
  0x16   :  { %v63_v8 = vsel %vm62_vm0, %v52_v4, -inf  ;;  %v70_v9 = vsel %vm62_vm0, %v53_v5, -inf  ;;  %v77_v10 = vsel %vm62_vm0, %v56_v6, -inf  ;;  %v84_v11 = vsel %vm62_vm0, %v57_v7, -inf  ;;  %105 = vst [vmem:[#allocation1] ss:$2 sm:$0xff] %v549_v2 }
  0x17   :  { %v64_v12 = vrot.slane %v63_v8, 4  ;;  %v71_v13 = vrot.slane %v70_v9, 4  ;;  %v78_v14 = vrot.slane %v77_v10, 4  ;;  %v85_v15 = vrot.slane %v84_v11, 4  ;;  %109 = vst [vmem:[#allocation1 + $0x10] ss:$2 sm:$0xff] %v551_v3 }
  0x19   :  { %v65_v16 = vmax.f32 %v63_v8, %v64_v12  ;;  %v72_v17 = vmax.f32 %v70_v9, %v71_v13  ;;  %v79_v18 = vmax.f32 %v77_v10, %v78_v14  ;;  %v86_v19 = vmax.f32 %v84_v11, %v85_v15 }
  0x1b   :  { %v66_v20 = vrot.slane %v65_v16, 2  ;;  %v73_v21 = vrot.slane %v72_v17, 2  ;;  %v80_v22 = vrot.slane %v79_v18, 2  ;;  %v87_v23 = vrot.slane %v86_v19, 2 }
  0x1d   :  { %v67_v24 = vmax.f32 %v65_v16, %v66_v20  ;;  %v74_v25 = vmax.f32 %v72_v17, %v73_v21  ;;  %v81_v26 = vmax.f32 %v79_v18, %v80_v22  ;;  %v88_v27 = vmax.f32 %v86_v19, %v87_v23  ;;  %v106_v28 = vld.sshfl [vmem:[#allocation1] sm:$0xff pattern:$0x75316420]  ;;  %v107_v29 = vld.sshfl [vmem:[#allocation1 + $0x8] sm:$0xff pattern:$0x75316420] }
  0x1e   :  { %v110_v30 = vld.sshfl [vmem:[#allocation1 + $0x10] sm:$0xff pattern:$0x75316420]  ;;  %v111_v31 = vld.sshfl [vmem:[#allocation1 + $0x18] sm:$0xff pattern:$0x75316420] }
  0x1f   :  { %v68_v32 = vrot.slane %v67_v24, 1  ;;  %v75_v33 = vrot.slane %v74_v25, 1  ;;  %v82_v34 = vrot.slane %v81_v26, 1  ;;  %v89_v35 = vrot.slane %v88_v27, 1 }
  0x20   :  { %v116_v36 = vsel %vm62_vm0, %v106_v28, -inf  ;;  %v123_v37 = vsel %vm62_vm0, %v107_v29, -inf  ;;  %v130_v38 = vsel %vm62_vm0, %v110_v30, -inf  ;;  %v137_v39 = vsel %vm62_vm0, %v111_v31, -inf }
  0x21   :  { %v69_v40 = vmax.f32 %v67_v24, %v68_v32  ;;  %v76_v41 = vmax.f32 %v74_v25, %v75_v33  ;;  %v83_v42 = vmax.f32 %v81_v26, %v82_v34  ;;  %v90_v43 = vmax.f32 %v88_v27, %v89_v35 }
  0x22   :  { %v117_v44 = vrot.slane %v116_v36, 4  ;;  %v124_v45 = vrot.slane %v123_v37, 4  ;;  %v131_v46 = vrot.slane %v130_v38, 4  ;;  %v138_v47 = vrot.slane %v137_v39, 4 }
  0x23   :  { %v95_v48 = vrot.slane %v76_v41, 4  ;;  %v96_v49 = vrot.slane %v90_v43, 4 }
  0x24   :  { %v118_v50 = vmax.f32 %v116_v36, %v117_v44  ;;  %v125_v51 = vmax.f32 %v123_v37, %v124_v45  ;;  %v132_v52 = vmax.f32 %v130_v38, %v131_v46  ;;  %v139_v53 = vmax.f32 %v137_v39, %v138_v47 }
  0x25   :  { %v97_v54 = vsel %vm62_vm0, %v69_v40, %v95_v48  ;;  %v98_v55 = vsel %vm62_vm0, %v83_v42, %v96_v49 }
  0x26   :  { %v565_v56 = vsub.f32 %v45_v0, %v97_v54  ;;  %v567_v57 = vsub.f32 %v46_v1, %v98_v55  ;;  %v119_v58 = vrot.slane %v118_v50, 2  ;;  %v126_v59 = vrot.slane %v125_v51, 2 }
  0x27   :  { %v133_v60 = vrot.slane %v132_v52, 2  ;;  %v140_v61 = vrot.slane %v139_v53, 2 }
  0x28   :  { %v120_v62 = vmax.f32 %v118_v50, %v119_v58  ;;  %v127_v63 = vmax.f32 %v125_v51, %v126_v59  ;;  %v156_v4 = vmul.f32 1.442695, %v565_v56  ;;  %v158_v5 = vmul.f32 1.442695, %v567_v57 }
  0x29   :  { %v134_v6 = vmax.f32 %v132_v52, %v133_v60  ;;  %v141_v7 = vmax.f32 %v139_v53, %v140_v61 }
  0x2a   :  { %v121_v8 = vrot.slane %v120_v62, 1  ;;  %v128_v9 = vrot.slane %v127_v63, 1  ;;  %413 = vpow2.f32 %v156_v4 }
  0x2b   :  { %v135_v10 = vrot.slane %v134_v6, 1  ;;  %v142_v0 = vrot.slane %v141_v7, 1  ;;  %415 = vpow2.f32 %v158_v5 }
  0x2c   :  { %v122_v1 = vmax.f32 %v120_v62, %v121_v8  ;;  %v129_v11 = vmax.f32 %v127_v63, %v128_v9 }
  0x2d   :  { %v136_v12 = vmax.f32 %v134_v6, %v135_v10  ;;  %v143_v13 = vmax.f32 %v141_v7, %v142_v0 }
  0x2e   :  { %v148_v14 = vrot.slane %v129_v11, 4 }
  0x2f   :  { %v149_v15 = vrot.slane %v143_v13, 4 }
  0x30   :  { %v571_v16 = vpop.eup %413  ;;  %v150_v17 = vsel %vm62_vm0, %v122_v1, %v148_v14 }
  0x31   :  { %v574_v18 = vpop.eup %415  ;;  %v151_v19 = vsel %vm62_vm0, %v136_v12, %v149_v15  ;;  %v578_v20 = vsub.f32 %v549_v2, %v150_v17  ;;  %166 = vst [vmem:[#allocation1] ss:$2 sm:$0xff] %v571_v16 }
  0x32   :  { %v582_v21 = vsub.f32 %v551_v3, %v151_v19  ;;  %170 = vst [vmem:[#allocation1 + $0x10] ss:$2 sm:$0xff] %v574_v18 }
  0x33   :  { %v160_v22 = vmul.f32 1.442695, %v578_v20 }
  0x34   :  { %v162_v23 = vmul.f32 1.442695, %v582_v21 }
  0x35   :  { %417 = vpow2.f32 %v160_v22 }
  0x36   :  { %419 = vpow2.f32 %v162_v23 }
  0x38   :  { %v167_v24 = vld.sshfl [vmem:[#allocation1] sm:$0xff pattern:$0x75316420]  ;;  %v168_v25 = vld.sshfl [vmem:[#allocation1 + $0x8] sm:$0xff pattern:$0x75316420] }
  0x39   :  { %v171_v26 = vld.sshfl [vmem:[#allocation1 + $0x10] sm:$0xff pattern:$0x75316420]  ;;  %v172_v27 = vld.sshfl [vmem:[#allocation1 + $0x18] sm:$0xff pattern:$0x75316420] }
  0x3a   :  { %v177_v2 = vsel %vm62_vm0, %v167_v24, 0.0  ;;  %v184_v28 = vsel %vm62_vm0, %v168_v25, 0.0  ;;  %v191_v29 = vsel %vm62_vm0, %v171_v26, 0.0  ;;  %v198_v3 = vsel %vm62_vm0, %v172_v27, 0.0 }
  0x3b   :  { %v418_v30 = vpop.eup %417  ;;  %v178_v31 = vrot.slane %v177_v2, 4  ;;  %v185_v32 = vrot.slane %v184_v28, 4  ;;  %v192_v33 = vrot.slane %v191_v29, 4  ;;  %v199_v34 = vrot.slane %v198_v3, 4 }
  0x3c   :  { %v420_v35 = vpop.eup %419  ;;  %207 = vst [vmem:[#allocation1] ss:$2 sm:$0xff] %v418_v30 }
  0x3d   :  { %v179_v36 = vadd.f32 %v178_v31, %v177_v2  ;;  %v186_v37 = vadd.f32 %v185_v32, %v184_v28  ;;  %v193_v38 = vadd.f32 %v192_v33, %v191_v29  ;;  %v200_v39 = vadd.f32 %v199_v34, %v198_v3  ;;  %211 = vst [vmem:[#allocation1 + $0x10] ss:$2 sm:$0xff] %v420_v35 }
  0x3f   :  { %v180_v40 = vrot.slane %v179_v36, 2  ;;  %v187_v41 = vrot.slane %v186_v37, 2  ;;  %v194_v42 = vrot.slane %v193_v38, 2  ;;  %v201_v46 = vrot.slane %v200_v39, 2 }
  0x41   :  { %v181_v43 = vadd.f32 %v180_v40, %v179_v36  ;;  %v188_v44 = vadd.f32 %v187_v41, %v186_v37  ;;  %v195_v45 = vadd.f32 %v194_v42, %v193_v38  ;;  %v202_v54 = vadd.f32 %v201_v46, %v200_v39 }
  0x42   :  { %v318_v39 = vsub.f32 %v565_v56, %v578_v20 }
  0x43   :  { %v182_v47 = vrot.slane %v181_v43, 1  ;;  %v189_v48 = vrot.slane %v188_v44, 1  ;;  %v196_v49 = vrot.slane %v195_v45, 1  ;;  %v208_v50 = vld.sshfl [vmem:[#allocation1] sm:$0xff pattern:$0x75316420] }
  0x44   :  { %v209_v51 = vld.sshfl [vmem:[#allocation1 + $0x8] sm:$0xff pattern:$0x75316420]  ;;  %v212_v55 = vld.sshfl [vmem:[#allocation1 + $0x10] sm:$0xff pattern:$0x75316420] }
  0x45   :  { %v591_v52 = vadd.f32 %v182_v47, %v181_v43  ;;  %v593_v53 = vadd.f32 %v189_v48, %v188_v44  ;;  %v213_v58 = vld.sshfl [vmem:[#allocation1 + $0x18] sm:$0xff pattern:$0x75316420]  ;;  %v218_v59 = vsel %vm62_vm0, %v208_v50, 0.0  ;;  %v225_v60 = vsel %vm62_vm0, %v209_v51, 0.0 }
  0x46   :  { %v232_v61 = vsel %vm62_vm0, %v212_v55, 0.0  ;;  %v239_v62 = vsel %vm62_vm0, %v213_v58, 0.0  ;;  %v219_v63 = vrot.slane %v218_v59, 4  ;;  %v226_v4 = vrot.slane %v225_v60, 4 }
  0x47   :  { %v233_v5 = vrot.slane %v232_v61, 4  ;;  %v240_v6 = vrot.slane %v239_v62, 4  ;;  %v599_v7 = vadd.f32 %v196_v49, %v195_v45  ;;  %421 = vrcp.f32 %v591_v52 }
  0x48   :  { %v220_v8 = vadd.f32 %v219_v63, %v218_v59  ;;  %v227_v9 = vadd.f32 %v226_v4, %v225_v60  ;;  %v203_v1 = vrot.slane %v202_v54, 1  ;;  %423 = vrcp.f32 %v593_v53 }
  0x49   :  { %v234_v10 = vadd.f32 %v233_v5, %v232_v61  ;;  %v241_v0 = vadd.f32 %v240_v6, %v239_v62  ;;  %425 = vrcp.f32 %v599_v7  ;;  %v255_v25 = vand.u32 2147483647, %v591_v52 }
  0x4a   :  { %v221_v11 = vrot.slane %v220_v8, 2  ;;  %v228_v12 = vrot.slane %v227_v9, 2  ;;  %v606_v24 = vadd.f32 %v203_v1, %v202_v54  ;;  %v257_v28 = vand.u32 2147483648, %v591_v52 }
  0x4b   :  { %v235_v13 = vrot.slane %v234_v10, 2  ;;  %v242_v14 = vrot.slane %v241_v0, 2  ;;  %vm251_vm1 = vweird.f32 %v591_v52  ;;  %v270_v32 = vand.u32 2147483647, %v593_v53 }
  0x4c   :  { %v222_v15 = vadd.f32 %v221_v11, %v220_v8  ;;  %v229_v17 = vadd.f32 %v228_v12, %v227_v9  ;;  %v272_v33 = vand.u32 2147483648, %v593_v53  ;;  %427 = vrcp.f32 %v606_v24 }
  0x4d   :  { %v236_v19 = vadd.f32 %v235_v13, %v234_v10  ;;  %v243_v22 = vadd.f32 %v242_v14, %v241_v0  ;;  %v604_v23 = vpop.eup %421  ;;  %vm619_vm2 = vcmp.eq.f32.partialorder %v255_v25, 8.507059e+37  ;;  %v258_v40 = vor.u32 1.1754944e-38, %v257_v28 }
  0x4e   :  { %v223_v26 = vrot.slane %v222_v15, 1  ;;  %v230_v27 = vrot.slane %v229_v17, 1  ;;  %v424_v29 = vpop.eup %423  ;;  %v247_v3 = vmul.f32 %v604_v23, %v591_v52  ;;  %vm266_vm3 = vweird.f32 %v593_v53 }
  0x4f   :  { %v237_v2 = vrot.slane %v236_v19, 1  ;;  %v244_v31 = vrot.slane %v243_v22, 1  ;;  %v615_v34 = vpop.eup %425  ;;  %v262_v37 = vmul.f32 %v424_v29, %v593_v53  ;;  %vm267_vm4 = vweird.f32 %v424_v29 }
  0x50   :  { %v224_v30 = vadd.f32 %v223_v26, %v222_v15  ;;  %v231_v35 = vadd.f32 %v230_v27, %v229_v17  ;;  %v248_v36 = vsub.f32 1.0, %v247_v3  ;;  %v277_v41 = vmul.f32 %v615_v34, %v599_v7  ;;  %vm636_vm8 = vmor %vm266_vm3, %vm267_vm4 }
  0x51   :  { %v238_v38 = vadd.f32 %v237_v2, %v236_v19  ;;  %v263_v43 = vsub.f32 1.0, %v262_v37  ;;  %vm281_vm5 = vweird.f32 %v599_v7  ;;  %v245_v44 = vadd.f32 %v244_v31, %v243_v22 }
  0x52   :  { %v249_v42 = vmul.f32 %v604_v23, %v248_v36  ;;  %vm252_vm6 = vweird.f32 %v604_v23  ;;  %v278_v45 = vsub.f32 1.0, %v277_v41  ;;  %429 = vlog2.f32 %v224_v30  ;;  %v428_v55 = vpop.eup %427 }
  0x53   :  { %v264_v46 = vmul.f32 %v424_v29, %v263_v43  ;;  %vm629_vm7 = vcmp.eq.f32.partialorder %v270_v32, 8.507059e+37  ;;  %v273_v48 = vor.u32 1.1754944e-38, %v272_v33  ;;  %431 = vlog2.f32 %v231_v35  ;;  %vm644_vm9 = vmor %vm251_vm1, %vm252_vm6 }
  0x54   :  { %v250_v49 = vadd.f32 %v604_v23, %v249_v42  ;;  %v279_v51 = vmul.f32 %v615_v34, %v278_v45  ;;  %v285_v54 = vand.u32 2147483647, %v599_v7  ;;  %433 = vlog2.f32 %v238_v38 }
  0x55   :  { %v265_v59 = vadd.f32 %v424_v29, %v264_v46  ;;  %vm282_vm10 = vweird.f32 %v615_v34  ;;  %v287_v60 = vand.u32 2147483648, %v599_v7  ;;  %435 = vlog2.f32 %v591_v52 }
  0x56   :  { %v292_v61 = vmul.f32 %v428_v55, %v606_v24  ;;  %vm296_vm11 = vweird.f32 %v606_v24  ;;  %v300_v62 = vand.u32 2147483647, %v606_v24  ;;  %437 = vlog2.f32 %v245_v44  ;;  %vm666_vm12 = vmor %vm281_vm5, %vm282_vm10 }
  0x57   :  { %v269_v63 = vsel %vm636_vm8, %v424_v29, %v265_v59  ;;  %v280_v4 = vadd.f32 %v615_v34, %v279_v51  ;;  %v302_v5 = vand.u32 2147483648, %v606_v24  ;;  %439 = vlog2.f32 %v593_v53 }
  0x58   :  { %v430_v6 = vpop.eup %429  ;;  %v254_v52 = vsel %vm644_vm9, %v604_v23, %v250_v49  ;;  %v274_v8 = vsel %vm629_vm7, %v273_v48, %v269_v63  ;;  %v293_v10 = vsub.f32 1.0, %v292_v61  ;;  %vm297_vm13 = vweird.f32 %v428_v55 }
  0x59   :  { %v432_v0 = vpop.eup %431  ;;  %vm670_vm14 = vcmp.eq.f32.partialorder %v285_v54, 8.507059e+37  ;;  %441 = vlog2.f32 %v599_v7  ;;  %v288_v11 = vor.u32 1.1754944e-38, %v287_v60  ;;  %vm675_vm15 = vcmp.eq.f32.partialorder %v300_v62, 8.507059e+37  ;;  %vm298_vm1 = vmor %vm296_vm11, %vm297_vm13 }
  0x5a   :  { %v434_v53 = vpop.eup %433  ;;  %v294_v12 = vmul.f32 %v428_v55, %v293_v10  ;;  %443 = vlog2.f32 %v606_v24  ;;  %v259_v15 = vsel %vm619_vm2, %v258_v40, %v254_v52  ;;  %v284_v17 = vsel %vm666_vm12, %v615_v34, %v280_v4 }
  0x5b   :  { %v436_v14 = vpop.eup %435  ;;  %v303_v7 = vor.u32 1.1754944e-38, %v302_v5  ;;  %v310_v19 = vrot.slane %v274_v8, 4  ;;  %v321_v25 = vmul.f32 0.6931472, %v430_v6  ;;  %v323_v26 = vmul.f32 0.6931472, %v432_v0 }
  0x5c   :  { %v438_v22 = vpop.eup %437  ;;  %v295_v23 = vadd.f32 %v428_v55, %v294_v12  ;;  %v329_v27 = vmul.f32 0.6931472, %v436_v14  ;;  %v289_v28 = vsel %vm670_vm14, %v288_v11, %v284_v17  ;;  %v325_v32 = vmul.f32 0.6931472, %v434_v53 }
  0x5d   :  { %v440_v2 = vpop.eup %439  ;;  %v312_v24 = vsel %vm62_vm0, %v259_v15, %v310_v19  ;;  %v327_v33 = vmul.f32 0.6931472, %v438_v22  ;;  %v319_v46 = vsub.f32 %v567_v57, %v582_v21  ;;  %vm384_vm2 = vcmask 0  }
  0x5e   :  { %v299_v29 = vsel %vm298_vm1, %v428_v55, %v295_v23  ;;  %v331_v3 = vmul.f32 0.6931472, %v440_v2  ;;  %v336_v37 = vsub.f32 %v321_v25, %v329_v27  ;;  %v316_v43 = vmul.f32 %v571_v16, %v312_v24 }
  0x5f   :  { %v442_v30 = vpop.eup %441  ;;  %v304_v31 = vsel %vm675_vm15, %v303_v7, %v299_v29 }
  0x60   :  { %v444_v34 = vpop.eup %443  ;;  %v311_v35 = vrot.slane %v304_v31, 4  ;;  %v333_v36 = vmul.f32 0.6931472, %v442_v30  ;;  %v337_v38 = vsub.f32 %v323_v26, %v331_v3 }
  0x61   :  { %v335_v40 = vmul.f32 0.6931472, %v444_v34 }
  0x62   :  { %v344_v41 = vrot.slane %v337_v38, 4  ;;  %v313_v42 = vsel %vm62_vm0, %v289_v28, %v311_v35  ;;  %v338_v44 = vsub.f32 %v325_v32, %v333_v36 }
  0x63   :  { %v339_v45 = vsub.f32 %v327_v33, %v335_v40  ;;  %v317_v50 = vmul.f32 %v574_v18, %v313_v42 }
  0x64   :  { %v346_v47 = vsel %vm62_vm0, %v336_v37, %v344_v41 }
  0x65   :  { %v345_v48 = vrot.slane %v339_v45, 4  ;;  %v350_v49 = vadd.f32 %v346_v47, %v318_v39 }
  0x67   :  { %v347_v51 = vsel %vm62_vm0, %v338_v44, %v345_v48  ;;  %v352_v56 = vmul.f32 %v350_v49, %v316_v43 }
  0x68   :  { %v351_v20 = vadd.f32 %v347_v51, %v319_v46 }
  0x69   :  { %356 = vst [vmem:[#allocation1] ss:$2 sm:$0xff] %v352_v56 }
  0x6a   :  { %v353_v54 = vmul.f32 %v351_v20, %v317_v50 }
  0x6c   :  { %360 = vst [vmem:[#allocation1 + $0x10] ss:$2 sm:$0xff] %v353_v54 }
  0x70   :  { %v357_v55 = vld.sshfl [vmem:[#allocation1] sm:$0xff pattern:$0x75316420]  ;;  %v358_v16 = vld.sshfl [vmem:[#allocation1 + $0x8] sm:$0xff pattern:$0x75316420] }
  0x71   :  { %v367_v58 = vsel %vm62_vm0, %v357_v55, 0.0  ;;  %v368_v59 = vsel %vm62_vm0, %v358_v16, 0.0 }
  0x72   :  { %v369_v57 = vadd.f32 %v368_v59, %v367_v58 }
  0x73   :  { %v361_v21 = vld.sshfl [vmem:[#allocation1 + $0x10] sm:$0xff pattern:$0x75316420]  ;;  %v362_v60 = vld.sshfl [vmem:[#allocation1 + $0x18] sm:$0xff pattern:$0x75316420] }
  0x74   :  { %v370_v61 = vsel %vm62_vm0, %v361_v21, 0.0  ;;  %v372_v18 = vsel %vm62_vm0, %v362_v60, 0.0 }
  0x75   :  { %v371_v62 = vadd.f32 %v370_v61, %v369_v57 }
  0x77   :  { %v373_v63 = vadd.f32 %v372_v18, %v371_v62 }
  0x79   :  { %374 = vadd.xlane.f32.xlu0 %v373_v63 }
  0xec   :  { %v375_v4 = vpop.xlane.xlu0 %374 }
  0xed   :  { %v376_v5 = vrot.slane %v375_v4, 4 }
  0xef   :  { %v377_v6 = vadd.f32 %v376_v5, %v375_v4 }
  0xf1   :  { %v378_v52 = vrot.slane %v377_v6, 2 }
  0xf3   :  { %v379_v8 = vadd.f32 %v378_v52, %v377_v6 }
  0xf5   :  { %v380_v9 = vrot.slane %v379_v8, 1 }
  0xf7   :  { %v381_v10 = vadd.f32 %v380_v9, %v379_v8 }
  0xf9   :  { %406 = vpush %v381_v10 }
 0x12a   :  { %s407_s24 = spop %406 }
 0x12b   :  { %v383_v0 = vstv %s407_s24 }
 0x12c   :  { %385 = vst.msk [vmem:[#allocation7] sm:$0x1] %vm384_vm2, %v383_v0 }
 0x12d   :  { %398 = dma.vmem_to_hbm [thread:$0]  %s394_s1, 16, %s396_s23, [#allocation4]  }
 0x12e   :  { %521 = dma.done.wait [#allocation4], 16  }
 0x12f   :  { %522 = vsyncadd [#allocation4], 4294967280 }
 0x130   :  { %403 = vsyncpa [#allocation3], 1 }
 0x131   :  { %404 = vsyncpa [#allocation6], 1 }
 0x132   :  { %405 = vsyncpa [#allocation4], 1 }

</bundles_post_ra>
